<compile_context>
chip_gen: v5e
topology: v5e:2x2
jax: 0.10.0
libtpu: 0.0.40
codegen_flags: <defaults>
</compile_context>

<pallas_src>
import math

import jax
import jax.numpy as jnp
from jax.experimental import pallas as pl
from jax.experimental.pallas import tpu as pltpu

# Small synthetic LLaMA-like config.
B = 2            # batch
Q_LEN = 8        # sequence length
HIDDEN = 32      # hidden_size
NUM_HEADS = 4    # num_attention_heads
HEAD_DIM = HIDDEN // NUM_HEADS
ADAPTER_LEN = 8  # adapter_len
BQ = B * Q_LEN
NHL = NUM_HEADS * ADAPTER_LEN
# TODO(synk): factor = k_proj.in_features // k_proj.out_features is 1 here (no GQA),
# so torch.repeat_interleave(..., repeats=factor, dim=1) is the identity.

# Rows of (batch*seq) processed per grid step (multiple of 8 sublanes).
# At production dims pick the largest multiple of 8 whose double-buffered row tiles
# (q + base + out + scores) plus the resident kT/vw fit the scoped VMEM budget;
# roughly halve the tile on v7x (64 MiB physical VMEM vs 128 MiB on v5e/v6e).
TILE_ROWS = 8


# ----------------------------------------------------------------------------
# Pallas kernel: one row tile per grid step, all heads fused per tile.
# ----------------------------------------------------------------------------
def adapted_attention_kernel(gate_ref, q_ref, kT_ref, vw_ref, base_ref,
                             out_ref, scores_ref):
    gate = gate_ref[0]                                   # scalar adaption_gate (SMEM)

    # Per-head scores: (NH, T, D) x (NH, D, L) -> (NH, T, L).
    # The 1/sqrt(head_dim) scale is folded into kT in the wrapper.
    s = jnp.einsum('htd,hdl->htl', q_ref[...], kT_ref[...],
                   preferred_element_type=jnp.float32)

    # Per-head softmax in f32 (per-head max: numerically robust, matches reference).
    m = jnp.max(s, axis=-1, keepdims=True)               # (NH, T, 1)
    e = jnp.exp(s - m)                                    # (NH, T, L)
    denom = jnp.sum(e, axis=-1, keepdims=True)            # (NH, T, 1)
    # Reciprocal on the EUP; gate folded into the per-head normalization factor.
    sg = e * (gate * pl.reciprocal(denom, approx=False))  # gated probabilities

    scores_ref[...] = sg.astype(scores_ref.dtype)

    # Adapter output with o_proj fused: (NH, T, L) x (NH, L, HIDDEN) -> sum over heads.
    partial = jnp.einsum('htl,hlo->hto', sg, vw_ref[...],
                         preferred_element_type=jnp.float32)      # (NH, T, HIDDEN)
    out_ref[...] = (base_ref[...] + jnp.sum(partial, axis=0)).astype(out_ref.dtype)


def adapted_attention_pallas(gate, query_states, adapter_k, adapter_v, base_out, wo):
    """Adapter hot path in Pallas; batch-independent operand prep in plain JAX."""
    # (B, NH, Q, D) -> (NH, B*Q, D): head-leading so the kernel does per-head batched
    # matmuls (FLOPs scale with HEAD_DIM, not HIDDEN).
    q_heads = query_states.transpose(1, 0, 2, 3).reshape(NUM_HEADS, BQ, HEAD_DIM)

    # Resident per-head K^T with the 1/sqrt(head_dim) scale folded in (batch-independent).
    scale = 1.0 / math.sqrt(HEAD_DIM)
    kT = jnp.transpose(adapter_k, (0, 2, 1)) * scale                   # (NH, D, L)

    # Resident fused V . Wo^T: vw[h, l] = adapter_v[h, l] @ Wo^T[h*D:(h+1)*D, :].
    wo_t = wo.T.reshape(NUM_HEADS, HEAD_DIM, HIDDEN)
    vw = jnp.einsum('hld,hdo->hlo', adapter_v, wo_t)                   # (NH, L, HIDDEN)

    base_flat = base_out.reshape(BQ, HIDDEN)

    grid = (BQ // TILE_ROWS,)

    # Advisory cost estimate (helps XLA schedule around this tiny custom call).
    flops = 2 * BQ * NUM_HEADS * HEAD_DIM * ADAPTER_LEN \
          + 2 * BQ * NUM_HEADS * ADAPTER_LEN * HIDDEN
    transcendentals = BQ * NUM_HEADS * ADAPTER_LEN
    bytes_accessed = 4 * (NUM_HEADS * BQ * HEAD_DIM        # q
                          + NUM_HEADS * HEAD_DIM * ADAPTER_LEN
                          + NUM_HEADS * ADAPTER_LEN * HIDDEN
                          + 2 * BQ * HIDDEN                # base + out
                          + NUM_HEADS * BQ * ADAPTER_LEN   # scores
                          + 1)

    out_shapes = (
        jax.ShapeDtypeStruct((BQ, HIDDEN), jnp.float32),
        jax.ShapeDtypeStruct((NUM_HEADS, BQ, ADAPTER_LEN), jnp.float32),
    )

    out_flat, scores_heads = pl.pallas_call(
        adapted_attention_kernel,
        out_shape=out_shapes,
        grid=grid,
        in_specs=[
            pl.BlockSpec(memory_space=pltpu.MemorySpace.SMEM),                      # gate (1,)
            pl.BlockSpec((NUM_HEADS, TILE_ROWS, HEAD_DIM), lambda i: (0, i, 0)),    # q row tile
            pl.BlockSpec((NUM_HEADS, HEAD_DIM, ADAPTER_LEN), lambda i: (0, 0, 0)),  # kT (resident)
            pl.BlockSpec((NUM_HEADS, ADAPTER_LEN, HIDDEN), lambda i: (0, 0, 0)),    # vw (resident)
            pl.BlockSpec((TILE_ROWS, HIDDEN), lambda i: (i, 0)),                    # base row tile
        ],
        out_specs=(
            pl.BlockSpec((TILE_ROWS, HIDDEN), lambda i: (i, 0)),                    # out row tile
            pl.BlockSpec((NUM_HEADS, TILE_ROWS, ADAPTER_LEN), lambda i: (0, i, 0)),  # scores tile
        ),
        input_output_aliases={4: 0},   # base_flat buffer -> main output
        compiler_params=pltpu.CompilerParams(
            dimension_semantics=("parallel",),    # shard row tiles across TCs on v7x
            # budget: 2 buffers x (q + base + out + scores row tiles) + resident kT + vw,
            # plus generous headroom; well under 64 MiB physical VMEM on v7x.
            vmem_limit_bytes=16 * 1024 * 1024,
        ),
        cost_estimate=pl.CostEstimate(flops=flops,
                                      transcendentals=transcendentals,
                                      bytes_accessed=bytes_accessed),
    )(gate, q_heads, kT, vw, base_flat)

    out = out_flat.reshape(B, Q_LEN, HIDDEN)
    scores = scores_heads.reshape(NUM_HEADS, B, Q_LEN, ADAPTER_LEN).transpose(1, 0, 2, 3)
    return out, scores


# ----------------------------------------------------------------------------
# Plain-JAX glue: rotary embedding, wrapped LlamaAttention, adapter projections.
# ----------------------------------------------------------------------------
def rope_cos_sin(q_len, head_dim):
    inv_freq = 1.0 / (10000.0 ** (jnp.arange(0, head_dim, 2, dtype=jnp.float32) / head_dim))
    pos = jnp.arange(q_len, dtype=jnp.float32)
    freqs = jnp.outer(pos, inv_freq)                      # (Q, D/2)
    emb = jnp.concatenate([freqs, freqs], axis=-1)        # (Q, D)
    return jnp.cos(emb), jnp.sin(emb)


def rotate_half(x):
    x1, x2 = jnp.split(x, 2, axis=-1)
    return jnp.concatenate([-x2, x1], axis=-1)


def apply_rope(x, cos, sin):
    # x: (B, H, Q, D)
    return x * cos[None, None] + rotate_half(x) * sin[None, None]


def base_llama_attention(hidden_states, wq, wk, wv, wo, cos, sin):
    """The wrapped `self.model(**kwargs)` (standard causal LlamaAttention), plain JAX."""
    bsz, q_len, hidden = hidden_states.shape

    def proj(w):
        return (hidden_states @ w.T).reshape(bsz, q_len, NUM_HEADS, HEAD_DIM).transpose(0, 2, 1, 3)

    q = apply_rope(proj(wq), cos, sin)
    k = apply_rope(proj(wk), cos, sin)
    v = proj(wv)
    scores = jnp.einsum('bhqd,bhkd->bhqk', q, k) / math.sqrt(HEAD_DIM)
    mask = jnp.tril(jnp.ones((q_len, q_len), dtype=bool))
    scores = jnp.where(mask, scores, -jnp.inf)
    probs = jax.nn.softmax(scores, axis=-1)
    ctx = jnp.einsum('bhqk,bhkd->bhqd', probs, v).transpose(0, 2, 1, 3).reshape(bsz, q_len, hidden)
    # `q` is exactly what compute_query_states(...) recomputes (rotary-applied q_proj).
    return ctx @ wo.T, q


def reference_adapted_attention(gate, query_states, adapter_k, adapter_v, base_out, wo):
    """Pure-JAX replica of the PyTorch adapter math, for correctness checking."""
    ak = jnp.broadcast_to(adapter_k[None], (B,) + adapter_k.shape)
    av = jnp.broadcast_to(adapter_v[None], (B,) + adapter_v.shape)
    s = jnp.einsum('bhqd,bhkd->bhqk', query_states, ak) / math.sqrt(HEAD_DIM)
    p = jax.nn.softmax(s.astype(jnp.float32), axis=-1)
    sg = gate[0] * p
    ao = jnp.einsum('bhqk,bhkd->bhqd', sg, av).transpose(0, 2, 1, 3).reshape(B, Q_LEN, HIDDEN)
    return base_out + ao @ wo.T, sg


if __name__ == "__main__":
    key = jax.random.PRNGKey(0)
    k_wq, k_wk, k_wv, k_wo, k_prompt, k_hs = jax.random.split(key, 6)

    wscale = 0.05
    wq = jax.random.normal(k_wq, (HIDDEN, HIDDEN), jnp.float32) * wscale
    wk = jax.random.normal(k_wk, (HIDDEN, HIDDEN), jnp.float32) * wscale
    wv = jax.random.normal(k_wv, (HIDDEN, HIDDEN), jnp.float32) * wscale
    wo = jax.random.normal(k_wo, (HIDDEN, HIDDEN), jnp.float32) * wscale

    # adaption_prompt ~ normal_(), shape (1, adapter_len, hidden_size)
    adaption_prompt = jax.random.normal(k_prompt, (1, ADAPTER_LEN, HIDDEN), jnp.float32)
    # __init__ zero-inits the gate; use a nonzero value so the adapter path is exercised.
    adaption_gate = jnp.array([0.5], dtype=jnp.float32)

    hidden_states = jax.random.normal(k_hs, (B, Q_LEN, HIDDEN), jnp.float32)

    cos, sin = rope_cos_sin(Q_LEN, HEAD_DIM)
    base_out, query_states = base_llama_attention(hidden_states, wq, wk, wv, wo, cos, sin)

    # key / value of the adaption prompt through the wrapped module's k_proj / v_proj.
    # TODO(synk): fused qkv (k_proj_layer == v_proj_layer split path) not modeled; llama uses separate projections.
    key_a = (adaption_prompt @ wk.T)[0]       # (L, HIDDEN)
    val_a = (adaption_prompt @ wv.T)[0]       # (L, HIDDEN)
    adapter_k = key_a.reshape(ADAPTER_LEN, NUM_HEADS, HEAD_DIM).transpose(1, 0, 2)   # (NH, L, D)
    adapter_v = val_a.reshape(ADAPTER_LEN, NUM_HEADS, HEAD_DIM).transpose(1, 0, 2)   # (NH, L, D)

    out, scores = jax.jit(adapted_attention_pallas)(
        adaption_gate, query_states, adapter_k, adapter_v, base_out, wo)
    jax.block_until_ready((out, scores))

    ref_out, ref_scores = reference_adapted_attention(
        adaption_gate, query_states, adapter_k, adapter_v, base_out, wo)

    assert jnp.allclose(out, ref_out, atol=1e-5, rtol=1e-5), "output mismatch"
    assert jnp.allclose(scores, ref_scores, atol=1e-5, rtol=1e-5), "scores mismatch"
    print("KERNEL_OK")
</pallas_src>

<mosaic_0001>
module attributes {stable_mosaic.version = 11 : i64} {
  func.func @adapted_attention_kernel(%arg0: i32, %arg1: memref<1xf32, #tpu.memory_space<smem>>, %arg2: memref<4x8x8xf32, #tpu.memory_space<vmem>>, %arg3: memref<4x8x8xf32, #tpu.memory_space<vmem>>, %arg4: memref<4x8x32xf32, #tpu.memory_space<vmem>>, %arg5: memref<8x32xf32, #tpu.memory_space<vmem>>, %arg6: memref<8x32xf32, #tpu.memory_space<vmem>>, %arg7: memref<4x8x8xf32, #tpu.memory_space<vmem>>) attributes {dimension_semantics = [#tpu.dimension_semantics<parallel>], iteration_bounds = array<i64: 2>, scalar_prefetch = 0 : i64, scratch_operands = 0 : i64, tpu.core_type = #tpu.core_type<tc>, window_params = [{transform_indices = @transform_0, window_bounds = array<i64: 1>}, {transform_indices = @transform_1, window_bounds = array<i64: 4, 8, 8>}, {pipeline_mode = #tpu.pipeline_mode<synchronous>, transform_indices = @transform_2, window_bounds = array<i64: 4, 8, 8>}, {pipeline_mode = #tpu.pipeline_mode<synchronous>, transform_indices = @transform_3, window_bounds = array<i64: 4, 8, 32>}, {transform_indices = @transform_4, window_bounds = array<i64: 8, 32>}, {transform_indices = @transform_5, window_bounds = array<i64: 8, 32>}, {transform_indices = @transform_6, window_bounds = array<i64: 4, 8, 8>}]} {
    %c0 = arith.constant 0 : index
    %0 = memref.load %arg1[%c0] : memref<1xf32, #tpu.memory_space<smem>>
    %c0_0 = arith.constant 0 : index
    %c0_1 = arith.constant 0 : index
    %c0_2 = arith.constant 0 : index
    %1 = vector.load %arg2[%c0_0, %c0_1, %c0_2] : memref<4x8x8xf32, #tpu.memory_space<vmem>>, vector<4x8x8xf32>
    %c0_3 = arith.constant 0 : index
    %c0_4 = arith.constant 0 : index
    %c0_5 = arith.constant 0 : index
    %2 = vector.load %arg3[%c0_3, %c0_4, %c0_5] : memref<4x8x8xf32, #tpu.memory_space<vmem>>, vector<4x8x8xf32>
    "tpu.trace_start"() <{level = 10 : i32, message = "htd,hdl->htl"}> : () -> ()
    %cst = arith.constant dense<0.000000e+00> : vector<4x8x8xf32>
    %3 = tpu.matmul %1, %2, %cst {dimension_numbers = #tpu.dot_dimension_numbers<[2], [1], [1], [2], [0, 0, 0, 1, 1, 2], [0], [0]>} : vector<4x8x8xf32>, vector<4x8x8xf32>, vector<4x8x8xf32> -> vector<4x8x8xf32>
    "tpu.trace_stop"() : () -> ()
    %cst_6 = arith.constant dense<0xFF800000> : vector<4x8xf32>
    %4 = vector.multi_reduction <maximumf>, %3, %cst_6 [2] : vector<4x8x8xf32> to vector<4x8xf32>
    %5 = vector.shape_cast %4 : vector<4x8xf32> to vector<4x8x1xf32>
    %6 = vector.broadcast %5 : vector<4x8x1xf32> to vector<4x8x8xf32>
    %7 = arith.subf %3, %6 : vector<4x8x8xf32>
    %8 = math.exp %7 : vector<4x8x8xf32>
    %cst_7 = arith.constant dense<0.000000e+00> : vector<4x8xf32>
    %9 = vector.multi_reduction <add>, %8, %cst_7 [2] : vector<4x8x8xf32> to vector<4x8xf32>
    %10 = vector.shape_cast %9 : vector<4x8xf32> to vector<4x8x1xf32>
    %11 = tpu.reciprocal %10 : vector<4x8x1xf32> -> vector<4x8x1xf32>
    %12 = vector.broadcast %0 : f32 to vector<4x8x1xf32>
    %13 = arith.mulf %12, %11 : vector<4x8x1xf32>
    %14 = vector.broadcast %13 : vector<4x8x1xf32> to vector<4x8x8xf32>
    %15 = arith.mulf %8, %14 : vector<4x8x8xf32>
    %c0_8 = arith.constant 0 : index
    %c0_9 = arith.constant 0 : index
    %c0_10 = arith.constant 0 : index
    %16 = vector.load %arg7[%c0_8, %c0_9, %c0_10] : memref<4x8x8xf32, #tpu.memory_space<vmem>>, vector<4x8x8xf32>
    tpu.vector_store %arg7[%c0_8, %c0_9, %c0_10], %15 {strides = array<i32>} : memref<4x8x8xf32, #tpu.memory_space<vmem>>, vector<4x8x8xf32>,
    %c0_11 = arith.constant 0 : index
    %c0_12 = arith.constant 0 : index
    %c0_13 = arith.constant 0 : index
    %17 = vector.load %arg4[%c0_11, %c0_12, %c0_13] : memref<4x8x32xf32, #tpu.memory_space<vmem>>, vector<4x8x32xf32>
    "tpu.trace_start"() <{level = 10 : i32, message = "htl,hlo->hto"}> : () -> ()
    %cst_14 = arith.constant dense<0.000000e+00> : vector<4x8x32xf32>
    %18 = tpu.matmul %15, %17, %cst_14 {dimension_numbers = #tpu.dot_dimension_numbers<[2], [1], [1], [2], [0, 0, 0, 1, 1, 2], [0], [0]>} : vector<4x8x8xf32>, vector<4x8x32xf32>, vector<4x8x32xf32> -> vector<4x8x32xf32>
    "tpu.trace_stop"() : () -> ()
    %c0_15 = arith.constant 0 : index
    %c0_16 = arith.constant 0 : index
    %19 = vector.load %arg5[%c0_15, %c0_16] : memref<8x32xf32, #tpu.memory_space<vmem>>, vector<8x32xf32>
    %cst_17 = arith.constant dense<0.000000e+00> : vector<8x32xf32>
    %20 = vector.multi_reduction <add>, %18, %cst_17 [0] : vector<4x8x32xf32> to vector<8x32xf32>
    %21 = arith.addf %19, %20 : vector<8x32xf32>
    %c0_18 = arith.constant 0 : index
    %c0_19 = arith.constant 0 : index
    %22 = vector.load %arg6[%c0_18, %c0_19] : memref<8x32xf32, #tpu.memory_space<vmem>>, vector<8x32xf32>
    tpu.vector_store %arg6[%c0_18, %c0_19], %21 {strides = array<i32>} : memref<8x32xf32, #tpu.memory_space<vmem>>, vector<8x32xf32>,
    return
  }
  func.func @transform_0(%arg0: i32) -> i32 {
    %c0_i32 = arith.constant 0 : i32
    %c0_i32_0 = arith.constant 0 : i32
    return %c0_i32 : i32
  }
  func.func @transform_1(%arg0: i32) -> (i32, i32, i32) {
    %c0_i32 = arith.constant 0 : i32
    %c0_i32_0 = arith.constant 0 : i32
    %c0_i32_1 = arith.constant 0 : i32
    return %c0_i32, %arg0, %c0_i32_0 : i32, i32, i32
  }
  func.func @transform_2(%arg0: i32) -> (i32, i32, i32) {
    %c0_i32 = arith.constant 0 : i32
    %c0_i32_0 = arith.constant 0 : i32
    %c0_i32_1 = arith.constant 0 : i32
    %c0_i32_2 = arith.constant 0 : i32
    return %c0_i32, %c0_i32_0, %c0_i32_1 : i32, i32, i32
  }
  func.func @transform_3(%arg0: i32) -> (i32, i32, i32) {
    %c0_i32 = arith.constant 0 : i32
    %c0_i32_0 = arith.constant 0 : i32
    %c0_i32_1 = arith.constant 0 : i32
    %c0_i32_2 = arith.constant 0 : i32
    return %c0_i32, %c0_i32_0, %c0_i32_1 : i32, i32, i32
  }
  func.func @transform_4(%arg0: i32) -> (i32, i32) {
    %c0_i32 = arith.constant 0 : i32
    %c0_i32_0 = arith.constant 0 : i32
    return %arg0, %c0_i32 : i32, i32
  }
  func.func @transform_5(%arg0: i32) -> (i32, i32) {
    %c0_i32 = arith.constant 0 : i32
    %c0_i32_0 = arith.constant 0 : i32
    return %arg0, %c0_i32 : i32, i32
  }
  func.func @transform_6(%arg0: i32) -> (i32, i32, i32) {
    %c0_i32 = arith.constant 0 : i32
    %c0_i32_0 = arith.constant 0 : i32
    %c0_i32_1 = arith.constant 0 : i32
    return %c0_i32, %arg0, %c0_i32_0 : i32, i32, i32
  }
}

</mosaic_0001>

<bundles_post_ra>
// kernel: adapted_attention_pallas.1
= control target key start
LH: loop header
LB: loop body
LE: loop exit
PB: predicated region body
PF: predicated region fallthrough
CT: control target
= control target key end

     0   :  { %s1056_s0 = inlined_call_operand.<no memory space> [shape: f32[1], index: 0, kind: input, shape index: {}]   ;;  %s1057_s1 = inlined_call_operand.vmem [shape: f32[4,16,8], index: 1, kind: input, shape index: {}]   ;;  %s1058_s2 = inlined_call_operand.vmem [shape: f32[4,8,8], index: 2, kind: input, shape index: {}]   ;;  %s1059_s3 = inlined_call_operand.vmem [shape: f32[4,8,32], index: 3, kind: input, shape index: {}]   ;;  %s1060_s4 = inlined_call_operand.vmem [shape: f32[16,32], index: 4, kind: input, shape index: {}, may-alias: {4,5}]   ;;  %s1061_s5 = inlined_call_operand.vmem [shape: f32[16,32], index: 5, kind: output, shape index: {0}, may-alias: {4,5}]   ;;  %s1062_s6 = inlined_call_operand.vmem [shape: f32[4,16,8], index: 6, kind: output, shape index: {1}]  }
   0x1   :  { %12 = sst [smem:[#allocation2]] %s1056_s0 }
   0x2   :  { %s914_s23 = smov 0   ;;  %s916_s24 = smov 0  }
   0x3   :  { %s918_s25 = smov 0  }
   0x4 LB: > { %s930_s0 = sadd.s32 4294967295, %s874_s25   ;;  %s933_s26 = sadd.s32 1, %s874_s25   ;;  %s874_s25 = sphi %s918_s25, %s1066_s25   ;;  %s870_s24 = sphi %s916_s24, %s1065_s24   ;;  %s866_s23 = sphi %s914_s23, %s1064_s23  }
   0x5   : > { %s43_s27 = ssub.s32 %s874_s25, %s933_s26  ;;  %s46_s28 = sadd.s32 1, %s870_s24 }
   0x6   : > { %p44_p0 = scmp.eq.s32.totalorder %s43_s27, 0  ;;  %p53_p1 = scmp.ne.s32.totalorder %s870_s24, %s866_s23 }
   0x7   : > { %p54_p2 = scmp.eq.s32.totalorder %s874_s25, 0  ;;  %p177_p3 = scmp.eq.s32.totalorder %s930_s0, 1 }
   0x8   : > { %s943_s29 = scalar_select %p44_p0, %s870_s24, %s46_s28  }
   0x9   : > { %p55_p4 = por %p54_p2, %p53_p1  ;;  %p945_p5 = por %p177_p3, %p53_p1 }
   0xa   : > { %p792_p6 = scmp.ge.s32.totalorder %s874_s25, 2 }
   0xc   : > { %208 = sbr.rel (%p792_p6) target bundleno = 25 (0x19), region = 28 }
  0x11   : > { %211 = sbr.rel (!%p55_p4) target bundleno = 25 (0x19), region = 32  ;;  %s213_s7 = sand.u32 (%p55_p4), 1, %s870_s24  }
  0x12   : > { %s794_s8 = sshll.u32 (%p55_p4), %s874_s25, 3  ;;  %s793_s9 = sshll.u32 (%p55_p4), %s213_s7, 5 }
  0x13   : > { %s217_s12 = scalar_lea.vmem (%p55_p4), %s1057_s1, %s794_s8  ;;  %s215_s13 = scalar_lea.vmem (%p55_p4), [#allocation3], %s793_s9 }
  0x14   : > { %v252_v0 = vld [vmem:[%s217_s12] sm:$0xff] (%p55_p4)  ;;  %v254_v1 = vld [vmem:[%s217_s12 + $0x10] sm:$0xff] (%p55_p4) }
  0x15   : > { %v256_v2 = vld [vmem:[%s217_s12 + $0x20] sm:$0xff] (%p55_p4)  ;;  %253 = vst [vmem:[%s215_s13] sm:$0xff] (%p55_p4), %v252_v0  ;;  %v258_v3 = vld [vmem:[%s217_s12 + $0x30] sm:$0xff] (%p55_p4) }
  0x16   : > { %255 = vst [vmem:[%s215_s13 + $0x8] sm:$0xff] %v254_v1 }
  0x17   : > { %257 = vst [vmem:[%s215_s13 + $0x10] sm:$0xff] %v256_v2 }
  0x18   : > { %259 = vst [vmem:[%s215_s13 + $0x18] sm:$0xff] %v258_v3 }
  0x19 PF: > { %p795_p7 = scmp.ge.s32.totalorder %s874_s25, 1  ;;  %p271_p8 = scmp.lt.s32.totalorder %s874_s25, 3 }
  0x1b   : > { %p272_p9 = pnand %p795_p7, %p271_p8 }
  0x1c   : > { %s278_s18 = sand.u32 (!%p272_p9), 1, %s866_s23   ;;  %s322_s13 = sld [smem:[#allocation2]] (!%p272_p9) }
  0x1d   : > { %275 = sbr.rel (%p272_p9) target bundleno = 581 (0x245), region = 74  ;;  %s967_s21 = sshll.u32 (!%p272_p9), %s278_s18, 5 }
  0x1e   : > { %s280_s27 = scalar_lea.vmem (!%p272_p9), [#allocation3], %s967_s21  ;;  %s1011_s14 = scalar_lea.vmem (!%p272_p9), [#allocation4], %s967_s21 }
  0x1f   : > { %p314_p10 = scmp.lt.s32.totalorder (!%p272_p9), %s930_s0, 1 }
  0x22   : > { %v327_v4 = vld [vmem:[%s1058_s2] sm:$0xff]  ;;  %v329_v5 = vld [vmem:[%s1058_s2 + $0x10] sm:$0xff]  ;;  %v328_v6 = vld [vmem:[%s1058_s2 + $0x8] sm:$0xff]  ;;  %vm331_vm0 = vcmask 64512   ;;  %v516_v59 = vstv %s322_s13  ;;  %s315_s15 = scalar_select %p314_p10, %s930_s0, 1 }
  0x23   : > { %350 = vmatpush.msra.mxu0 %v327_v4  ;;  %396 = vmatpush.msra.mxu2 %v329_v5  ;;  %v330_v7 = vld [vmem:[%s1058_s2 + $0x18] sm:$0xff]  ;;  %v323_v8 = vld [vmem:[%s280_s27] sm:$0xff]  ;;  %v325_v9 = vld [vmem:[%s280_s27 + $0x10] sm:$0xff]  ;;  %s809_s25 = sshll.u32 (%p945_p5), %s930_s0, 3 }
  0x24   : > { %373 = vmatpush.msra.mxu1 %v328_v6  ;;  %419 = vmatpush.msra.mxu3 %v330_v7  ;;  %v324_v10 = vld [vmem:[%s280_s27 + $0x8] sm:$0xff]  ;;  %v326_v11 = vld [vmem:[%s280_s27 + $0x18] sm:$0xff]  ;;  %v529_v40 = vld [vmem:[%s1059_s3] sm:$0xff]  ;;  %s798_s16 = sshll.u32 %s315_s15, 3  ;;  %s651_s28 = scalar_lea.vmem (%p945_p5), %s1062_s6, %s809_s25 }
  0x25   : > { %800 = vmatmul.msk.f32.vlgmr.msra.gmra.mxu0 %vm331_vm0, %v323_v8  ;;  %802 = vmatmul.msk.f32.vlgmr.msra.gmra.mxu2 %vm331_vm0, %v325_v9  ;;  %v531_v41 = vld [vmem:[%s1059_s3 + $0x10] sm:$0xff]  ;;  %v530_v42 = vld [vmem:[%s1059_s3 + $0x8] sm:$0xff]  ;;  %v532_v43 = vld [vmem:[%s1059_s3 + $0x18] sm:$0xff]  ;;  %s317_s19 = scalar_lea.vmem %s1060_s4, %s798_s16  ;;  %s321_s22 = scalar_lea.vmem %s1061_s5, %s798_s16 }
  0x26   : > { %801 = vmatmul.msk.f32.vlgmr.msra.gmra.mxu1 %vm331_vm0, %v324_v10  ;;  %803 = vmatmul.msk.f32.vlgmr.msra.gmra.mxu3 %vm331_vm0, %v326_v11 }
  0x27   : > { %551 = vmatpush.msrb.mxu0 %v529_v40  ;;  %597 = vmatpush.msrb.mxu2 %v531_v41 }
  0x28   : > { %574 = vmatpush.msrb.mxu1 %v530_v42  ;;  %620 = vmatpush.msrb.mxu3 %v532_v43  ;;  %v625_v42 = vld [vmem:[%s317_s19] sm:$0xff] }
  0xa2   : > { %v352_v12 = vpop.f32.mrf.mxu0 }
  0xa3   : > { %v424_v13 = vsel %vm331_vm0, %v352_v12, -inf  ;;  %v375_v14 = vpop.f32.mrf.mxu1 }
  0xa4   : > { %425 = vmax.xlane.f32.xlu1 %v424_v13  ;;  %v427_v17 = vsel %vm331_vm0, %v375_v14, -inf }
  0xa8   : > { %v398_v15 = vpop.f32.mrf.mxu2 }
  0xa9   : > { %v430_v16 = vsel %vm331_vm0, %v398_v15, -inf  ;;  %v421_v18 = vpop.f32.mrf.mxu3 }
  0xaa   : > { %431 = vmax.xlane.f32.xlu0 %v430_v16  ;;  %v433_v19 = vsel %vm331_vm0, %v421_v18, -inf }
  0xac   : > { %428 = vmax.xlane.f32.xlu1 %v427_v17 }
  0xb2   : > { %434 = vmax.xlane.f32.xlu0 %v433_v19 }
 0x117   : > { %v426_v20 = vpop.xlane.xlu1 %425 }
 0x118   : > { %v436_v21 = vsub.f32 %v352_v12, %v426_v20 }
 0x11a   : > { %v440_v22 = vmul.f32 1.442695, %v436_v21 }
 0x11c   : > { %836 = vpow2.f32 %v440_v22 }
 0x11d   : > { %v432_v23 = vpop.xlane.xlu0 %431 }
 0x11e   : > { %v438_v24 = vsub.f32 %v398_v15, %v432_v23 }
 0x11f   : > { %v429_v25 = vpop.xlane.xlu1 %428 }
 0x120   : > { %v444_v26 = vmul.f32 1.442695, %v438_v24  ;;  %v437_v27 = vsub.f32 %v375_v14, %v429_v25 }
 0x122   : > { %v981_v28 = vpop.eup %836  ;;  %838 = vpow2.f32 %v444_v26  ;;  %v442_v29 = vmul.f32 1.442695, %v437_v27 }
 0x123   : > { %v448_v30 = vsel %vm331_vm0, %v981_v28, 0.0 }
 0x124   : > { %840 = vpow2.f32 %v442_v29  ;;  %449 = vadd.xlane.f32.xlu0 %v448_v30 }
 0x125   : > { %v435_v31 = vpop.xlane.xlu0 %434 }
 0x126   : > { %v439_v32 = vsub.f32 %v421_v18, %v435_v31 }
 0x128   : > { %v985_v33 = vpop.eup %838  ;;  %v446_v34 = vmul.f32 1.442695, %v439_v32 }
 0x129   : > { %v454_v35 = vsel %vm331_vm0, %v985_v33, 0.0 }
 0x12a   : > { %v989_v36 = vpop.eup %840  ;;  %842 = vpow2.f32 %v446_v34  ;;  %455 = vadd.xlane.f32.xlu2 %v454_v35 }
 0x12b   : > { %v451_v37 = vsel %vm331_vm0, %v989_v36, 0.0 }
 0x12c   : > { %452 = vadd.xlane.f32.xlu1 %v451_v37 }
 0x130   : > { %v993_v38 = vpop.eup %842 }
 0x131   : > { %v457_v39 = vsel %vm331_vm0, %v993_v38, 0.0 }
 0x132   : > { %458 = vadd.xlane.f32.xlu2 %v457_v39 }
 0x197   : > { %v450_v44 = vpop.xlane.xlu0 %449 }
 0x198   : > { %844 = vrcp.f32 %v450_v44  ;;  %v471_v50 = vand.u32 2147483648, %v450_v44  ;;  %v469_v52 = vand.u32 2147483647, %v450_v44  ;;  %vm465_vm2 = vweird.f32 %v450_v44 }
 0x19a   : > { %v472_v58 = vor.u32 1.1754944e-38, %v471_v50  ;;  %vm470_vm4 = vcmp.eq.f32.partialorder %v469_v52, 8.507059e+37 }
 0x19d   : > { %v456_v45 = vpop.xlane.xlu2 %455 }
 0x19e   : > { %v845_v46 = vpop.eup %844  ;;  %846 = vrcp.f32 %v456_v45  ;;  %v497_v0 = vand.u32 2147483647, %v456_v45  ;;  %v499_v1 = vand.u32 2147483648, %v456_v45  ;;  %vm493_vm6 = vweird.f32 %v456_v45 }
 0x19f   : > { %v461_v47 = vmul.f32 %v845_v46, %v450_v44  ;;  %v453_v48 = vpop.xlane.xlu1 %452  ;;  %vm466_vm1 = vweird.f32 %v845_v46 }
 0x1a0   : > { %848 = vrcp.f32 %v453_v48  ;;  %vm467_vm3 = vmor %vm465_vm2, %vm466_vm1  ;;  %v483_v5 = vand.u32 2147483647, %v453_v48  ;;  %v485_v6 = vand.u32 2147483648, %v453_v48  ;;  %vm498_vm9 = vcmp.eq.f32.partialorder %v497_v0, 8.507059e+37 }
 0x1a1   : > { %v462_v49 = vsub.f32 1.0, %v461_v47  ;;  %v500_v11 = vor.u32 1.1754944e-38, %v499_v1  ;;  %vm479_vm10 = vweird.f32 %v453_v48  ;;  %vm626_vm2 = vcmask 261120  }
 0x1a2   : > { %v486_v15 = vor.u32 1.1754944e-38, %v485_v6  ;;  %vm484_vm12 = vcmp.eq.f32.partialorder %v483_v5, 8.507059e+37 }
 0x1a3   : > { %v463_v51 = vmul.f32 %v845_v46, %v462_v49 }
 0x1a4   : > { %v847_v53 = vpop.eup %846 }
 0x1a5   : > { %v464_v54 = vadd.f32 %v845_v46, %v463_v51  ;;  %v489_v55 = vmul.f32 %v847_v53, %v456_v45  ;;  %v459_v56 = vpop.xlane.xlu2 %458  ;;  %vm494_vm5 = vweird.f32 %v847_v53 }
 0x1a6   : > { %v849_v57 = vpop.eup %848  ;;  %850 = vrcp.f32 %v459_v56  ;;  %vm495_vm8 = vmor %vm493_vm6, %vm494_vm5  ;;  %v511_v21 = vand.u32 2147483647, %v459_v56  ;;  %v513_v22 = vand.u32 2147483648, %v459_v56  ;;  %vm507_vm14 = vweird.f32 %v459_v56 }
 0x1a7   : > { %v468_v60 = vsel %vm467_vm3, %v845_v46, %v464_v54  ;;  %v490_v61 = vsub.f32 1.0, %v489_v55  ;;  %v475_v62 = vmul.f32 %v849_v57, %v453_v48  ;;  %vm480_vm7 = vweird.f32 %v849_v57 }
 0x1a8   : > { %v473_v63 = vsel %vm470_vm4, %v472_v58, %v468_v60  ;;  %vm481_vm11 = vmor %vm479_vm10, %vm480_vm7  ;;  %vm512_vm1 = vcmp.eq.f32.partialorder %v511_v21, 8.507059e+37 }
 0x1a9   : > { %v491_v2 = vmul.f32 %v847_v53, %v490_v61  ;;  %v476_v3 = vsub.f32 1.0, %v475_v62  ;;  %v517_v4 = vmul.f32 %v516_v59, %v473_v63 }
 0x1ab   : > { %v492_v7 = vadd.f32 %v847_v53, %v491_v2  ;;  %v477_v8 = vmul.f32 %v849_v57, %v476_v3  ;;  %v521_v9 = vmul.f32 %v981_v28, %v517_v4  ;;  %v514_v28 = vor.u32 1.1754944e-38, %v513_v22 }
 0x1ac   : > { %v851_v10 = vpop.eup %850 }
 0x1ad   : > { %v496_v12 = vsel %vm495_vm8, %v847_v53, %v492_v7  ;;  %v478_v13 = vadd.f32 %v849_v57, %v477_v8  ;;  %v503_v14 = vmul.f32 %v851_v10, %v459_v56  ;;  %525 = vst.msk [vmem:[%s1011_s14] sm:$0xff] %vm331_vm0, %v521_v9  ;;  %804 = vmatmul.msk.f32.vlgmr.msrb.gmra.mxu0 %vm331_vm0, %v521_v9  ;;  %vm508_vm13 = vweird.f32 %v851_v10 }
 0x1ae   : > { %v501_v16 = vsel %vm498_vm9, %v500_v11, %v496_v12  ;;  %vm509_vm15 = vmor %vm507_vm14, %vm508_vm13 }
 0x1af   : > { %v482_v17 = vsel %vm481_vm11, %v849_v57, %v478_v13  ;;  %v504_v18 = vsub.f32 1.0, %v503_v14  ;;  %v519_v19 = vmul.f32 %v516_v59, %v501_v16 }
 0x1b0   : > { %v487_v20 = vsel %vm484_vm12, %v486_v15, %v482_v17 }
 0x1b1   : > { %v505_v23 = vmul.f32 %v851_v10, %v504_v18  ;;  %v523_v24 = vmul.f32 %v985_v33, %v519_v19  ;;  %v518_v25 = vmul.f32 %v516_v59, %v487_v20 }
 0x1b3   : > { %v506_v26 = vadd.f32 %v851_v10, %v505_v23  ;;  %527 = vst.msk [vmem:[%s1011_s14 + $0x10] sm:$0xff] %vm331_vm0, %v523_v24  ;;  %806 = vmatmul.msk.f32.vlgmr.msrb.gmra.mxu2 %vm331_vm0, %v523_v24  ;;  %v522_v27 = vmul.f32 %v989_v36, %v518_v25 }
 0x1b4   : > { %v686_v46 = vld [vmem:[%s1011_s14] sm:$0xff] (%p945_p5) }
 0x1b5   : > { %v510_v29 = vsel %vm509_vm15, %v851_v10, %v506_v26  ;;  %526 = vst.msk [vmem:[%s1011_s14 + $0x8] sm:$0xff] %vm331_vm0, %v522_v27  ;;  %805 = vmatmul.msk.f32.vlgmr.msrb.gmra.mxu1 %vm331_vm0, %v522_v27 }
 0x1b6   : > { %v515_v30 = vsel %vm512_vm1, %v514_v28, %v510_v29  ;;  %687 = vst [vmem:[%s651_s28] sm:$0xff] (%p945_p5), %v686_v46 }
 0x1b7   : > { %v520_v31 = vmul.f32 %v516_v59, %v515_v30 }
 0x1b9   : > { %v524_v32 = vmul.f32 %v993_v38, %v520_v31 }
 0x1ba   : > { %v690_v48 = vld [vmem:[%s1011_s14 + $0x10] sm:$0xff] (%p945_p5) }
 0x1bb   : > { %528 = vst.msk [vmem:[%s1011_s14 + $0x18] sm:$0xff] %vm331_vm0, %v524_v32  ;;  %807 = vmatmul.msk.f32.vlgmr.msrb.gmra.mxu3 %vm331_vm0, %v524_v32 }
 0x1bc   : > { %v688_v47 = vld [vmem:[%s1011_s14 + $0x8] sm:$0xff] (%p945_p5)  ;;  %691 = vst [vmem:[%s651_s28 + $0x20] sm:$0xff] (%p945_p5), %v690_v48 }
 0x1bd   : > { %689 = vst [vmem:[%s651_s28 + $0x10] sm:$0xff] (%p945_p5), %v688_v47 }
 0x1c2   : > { %v692_v49 = vld [vmem:[%s1011_s14 + $0x18] sm:$0xff] (%p945_p5) }
 0x1c3   : > { %693 = vst [vmem:[%s651_s28 + $0x30] sm:$0xff] (%p945_p5), %v692_v49 }
 0x22a   : > { %v553_v34 = vpop.f32.mrf.mxu0 }
 0x22b   : > { %v627_v37 = vsel %vm626_vm2, %v553_v34, 0.0 }
 0x232   : > { %v576_v33 = vpop.f32.mrf.mxu1 }
 0x233   : > { %v628_v36 = vsel %vm626_vm2, %v576_v33, 0.0 }
 0x234   : > { %v629_v40 = vadd.f32 %v628_v36, %v627_v37 }
 0x236   : > { %v599_v35 = vpop.f32.mrf.mxu2 }
 0x237   : > { %v630_v39 = vsel %vm626_vm2, %v599_v35, 0.0 }
 0x238   : > { %v631_v38 = vadd.f32 %v630_v39, %v629_v40 }
 0x23e   : > { %v622_v41 = vpop.f32.mrf.mxu3 }
 0x23f   : > { %v632_v43 = vsel %vm626_vm2, %v622_v41, 0.0 }
 0x240   : > { %v633_v44 = vadd.f32 %v632_v43, %v631_v38  ;;  %649 = sbr.rel (!%p945_p5) target bundleno = 581 (0x245), region = 86 }
 0x242   : > { %v634_v45 = vadd.f32 %v633_v44, %v625_v42 }
 0x244   : > { %635 = vst.msk [vmem:[%s321_s22] sm:$0xff] %vm626_vm2, %v634_v45 }
 0x245 PF: > { %p15_p11 = scmp.ge.s32.totalorder %s933_s26, 4   ;;  %s1064_s23 = smov %s870_s24 }
 0x246   : > { %s1065_s24 = smov %s943_s29  ;;  %s1066_s25 = smov %s933_s26 }
 0x247   :  { %17 = sbr.rel (!%p15_p11) target bundleno = 4 (0x4), region = 166 }

</bundles_post_ra>
